<compile_context>
chip_gen: v5e
topology: v5e:2x2
jax: 0.10.0
libtpu: 0.0.40
codegen_flags: <defaults>
</compile_context>

<pallas_src>
import jax
import jax.numpy as jnp
import numpy as np
from jax.experimental import pallas as pl
from jax.experimental.pallas import tpu as pltpu

EPS = 1e-6

# Same 3x3 weights the PyTorch module builds in __init__ (used only by the
# pure-JAX reference below).
KERNEL_V = jnp.asarray([[0.0, -1.0, 0.0],
                        [0.0,  0.0, 0.0],
                        [0.0,  1.0, 0.0]], dtype=jnp.float32).reshape(1, 1, 3, 3)
KERNEL_H = jnp.asarray([[ 0.0, 0.0, 0.0],
                        [-1.0, 0.0, 1.0],
                        [ 0.0, 0.0, 0.0]], dtype=jnp.float32).reshape(1, 1, 3, 3)


def _make_kernel(eps):
    """Kernel over one (H, W) image plane (batch / channel squeezed away)."""

    def kernel(x_ref, o_ref):
        x = x_ref[...]                                     # (H, W)
        H, W = x.shape

        zrow = jnp.zeros((1, W), x.dtype)
        zcol = jnp.zeros((H, 1), x.dtype)

        # Vertical 3x3 conv (kernel_v, padding=1): g_v[i,j] = x[i+1,j] - x[i-1,j]
        # The appended zero row reproduces the conv's zero padding exactly,
        # so no boundary masks are needed.
        down = jnp.concatenate([x[1:, :], zrow], axis=0)   # value at row i+1
        up = jnp.concatenate([zrow, x[:-1, :]], axis=0)    # value at row i-1
        g_v = down - up

        # Horizontal 3x3 conv (kernel_h, padding=1): g_h[i,j] = x[i,j+1] - x[i,j-1]
        right = jnp.concatenate([x[:, 1:], zcol], axis=1)  # value at col j+1
        left = jnp.concatenate([zcol, x[:, :-1]], axis=1)  # value at col j-1
        g_h = right - left

        o_ref[...] = jnp.sqrt(g_v * g_v + g_h * g_h + eps).astype(o_ref.dtype)

    return kernel


def get_gradient_nopadding(x):
    """x: (N, C, H, W) float32 with C >= 3.  Returns (N, 3, H, W)."""
    N, C, H, W = x.shape
    assert C >= 3, "module indexes channels 0, 1, 2"
    itemsize = jnp.dtype(x.dtype).itemsize
    block_bytes = H * W * itemsize

    # Generation-aware VMEM budget (v7x has only 64 MiB per TensorCore).
    try:
        vmem_cap = int(pltpu.get_tpu_info().vmem_capacity_bytes)
    except Exception:  # pragma: no cover - conservative fallback
        vmem_cap = 64 << 20

    # Real per-step live set: 2x double-buffered input + output blocks plus a
    # handful of block-sized shifted temporaries, with slack.
    vmem_needed = 10 * block_bytes + (2 << 20)
    vmem_limit = int(min(max(32 << 20, vmem_needed), vmem_cap - (4 << 20)))

    cost = pl.CostEstimate(
        flops=8 * N * 3 * H * W,                      # a few VPU ops / element
        transcendentals=N * 3 * H * W,                # one sqrt / element
        bytes_accessed=2 * N * 3 * H * W * itemsize,  # one read + one write pass
    )

    # Grid over (image, channel); each step reads exactly one used (H, W)
    # plane straight from the 4-D input (no pre-kernel slice/reshape copy)
    # and writes one output plane.  Last two block dims equal the full array
    # dims, so the (8,128) sublane/lane rule is always satisfied.
    grid = (N, 3)
    in_spec = pl.BlockSpec((None, None, H, W), lambda n, c: (n, c, 0, 0))
    out_spec = pl.BlockSpec((None, None, H, W), lambda n, c: (n, c, 0, 0))

    return pl.pallas_call(
        _make_kernel(EPS),
        out_shape=jax.ShapeDtypeStruct((N, 3, H, W), x.dtype),
        grid=grid,
        in_specs=[in_spec],
        out_specs=out_spec,
        compiler_params=pltpu.CompilerParams(
            dimension_semantics=("parallel", "parallel"),
            vmem_limit_bytes=vmem_limit,
        ),
        cost_estimate=cost,
    )(x)


def _reference(x):
    """Pure-JAX reference using the actual 3x3 conv weights (NCHW)."""
    def conv1(img, k):
        return jax.lax.conv_general_dilated(
            img, k, window_strides=(1, 1), padding=[(1, 1), (1, 1)],
            dimension_numbers=("NCHW", "OIHW", "NCHW"))
    outs = []
    for c in range(3):
        xc = x[:, c:c + 1]
        v = conv1(xc, KERNEL_V)
        h = conv1(xc, KERNEL_H)
        outs.append(jnp.sqrt(v * v + h * h + EPS))
    return jnp.concatenate(outs, axis=1)


if __name__ == "__main__":
    key = jax.random.PRNGKey(0)
    x = jax.random.normal(key, (2, 4, 16, 16), dtype=jnp.float32)

    out = jax.block_until_ready(get_gradient_nopadding(x))
    ref = jax.block_until_ready(_reference(x))

    np.testing.assert_allclose(np.asarray(out), np.asarray(ref),
                               rtol=1e-5, atol=1e-5)
    assert out.shape == (2, 3, 16, 16) and out.dtype == jnp.float32

    print("KERNEL_OK")
</pallas_src>

<mosaic_0001>
module attributes {stable_mosaic.version = 11 : i64} {
  func.func @kernel(%arg0: i32, %arg1: i32, %arg2: memref<1x1x16x16xf32, #tpu.memory_space<vmem>>, %arg3: memref<1x1x16x16xf32, #tpu.memory_space<vmem>>) attributes {dimension_semantics = [#tpu.dimension_semantics<parallel>, #tpu.dimension_semantics<parallel>], iteration_bounds = array<i64: 2, 3>, scalar_prefetch = 0 : i64, scratch_operands = 0 : i64, tpu.core_type = #tpu.core_type<tc>, window_params = [{transform_indices = @transform_0, window_bounds = array<i64: 1, 1, 16, 16>}, {transform_indices = @transform_1, window_bounds = array<i64: 1, 1, 16, 16>}]} {
    %c0 = arith.constant 0 : index
    %c0_0 = arith.constant 0 : index
    %c0_1 = arith.constant 0 : index
    %c0_2 = arith.constant 0 : index
    %0 = vector.load %arg2[%c0, %c0_0, %c0_1, %c0_2] : memref<1x1x16x16xf32, #tpu.memory_space<vmem>>, vector<1x1x16x16xf32>
    %1 = vector.shape_cast %0 : vector<1x1x16x16xf32> to vector<16x16xf32>
    %cst = arith.constant 0.000000e+00 : f32
    %2 = vector.broadcast %cst : f32 to vector<1x16xf32>
    %cst_3 = arith.constant 0.000000e+00 : f32
    %3 = vector.broadcast %cst_3 : f32 to vector<16x1xf32>
    %4 = vector.extract_strided_slice %1 {offsets = [1, 0], sizes = [15, 16], strides = [1, 1]} : vector<16x16xf32> to vector<15x16xf32>
    %5 = tpu.concatenate %4, %2 in 0 : vector<15x16xf32>, vector<1x16xf32> -> vector<16x16xf32>
    %6 = vector.extract_strided_slice %1 {offsets = [0, 0], sizes = [15, 16], strides = [1, 1]} : vector<16x16xf32> to vector<15x16xf32>
    %7 = tpu.concatenate %2, %6 in 0 : vector<1x16xf32>, vector<15x16xf32> -> vector<16x16xf32>
    %8 = arith.subf %5, %7 : vector<16x16xf32>
    %9 = vector.extract_strided_slice %1 {offsets = [0, 1], sizes = [16, 15], strides = [1, 1]} : vector<16x16xf32> to vector<16x15xf32>
    %10 = tpu.concatenate %9, %3 in 1 : vector<16x15xf32>, vector<16x1xf32> -> vector<16x16xf32>
    %11 = vector.extract_strided_slice %1 {offsets = [0, 0], sizes = [16, 15], strides = [1, 1]} : vector<16x16xf32> to vector<16x15xf32>
    %12 = tpu.concatenate %3, %11 in 1 : vector<16x1xf32>, vector<16x15xf32> -> vector<16x16xf32>
    %13 = arith.subf %10, %12 : vector<16x16xf32>
    %14 = arith.mulf %8, %8 : vector<16x16xf32>
    %15 = arith.mulf %13, %13 : vector<16x16xf32>
    %16 = arith.addf %14, %15 : vector<16x16xf32>
    %cst_4 = arith.constant 9.99999997E-7 : f32
    %17 = vector.broadcast %cst_4 : f32 to vector<16x16xf32>
    %18 = arith.addf %16, %17 : vector<16x16xf32>
    %19 = math.sqrt %18 : vector<16x16xf32>
    %c0_5 = arith.constant 0 : index
    %c0_6 = arith.constant 0 : index
    %c0_7 = arith.constant 0 : index
    %c0_8 = arith.constant 0 : index
    %20 = vector.load %arg3[%c0_5, %c0_6, %c0_7, %c0_8] : memref<1x1x16x16xf32, #tpu.memory_space<vmem>>, vector<1x1x16x16xf32>
    %21 = vector.shape_cast %20 : vector<1x1x16x16xf32> to vector<16x16xf32>
    %22 = vector.shape_cast %19 : vector<16x16xf32> to vector<1x1x16x16xf32>
    tpu.vector_store %arg3[%c0_5, %c0_6, %c0_7, %c0_8], %22 {strides = array<i32>} : memref<1x1x16x16xf32, #tpu.memory_space<vmem>>, vector<1x1x16x16xf32>,
    return
  }
  func.func @transform_0(%arg0: i32, %arg1: i32) -> (i32, i32, i32, i32) {
    %c0_i32 = arith.constant 0 : i32
    %c0_i32_0 = arith.constant 0 : i32
    %c0_i32_1 = arith.constant 0 : i32
    return %arg0, %arg1, %c0_i32, %c0_i32_0 : i32, i32, i32, i32
  }
  func.func @transform_1(%arg0: i32, %arg1: i32) -> (i32, i32, i32, i32) {
    %c0_i32 = arith.constant 0 : i32
    %c0_i32_0 = arith.constant 0 : i32
    %c0_i32_1 = arith.constant 0 : i32
    return %arg0, %arg1, %c0_i32, %c0_i32_0 : i32, i32, i32, i32
  }
}

</mosaic_0001>

<bundles_post_ra>
// kernel: tpu_custom_call.1
= control target key start
LH: loop header
LB: loop body
LE: loop exit
PB: predicated region body
PF: predicated region fallthrough
CT: control target
= control target key end

     0   :  { %6 = vsyncpa [#allocation3], 0  ;;  %s737_s0 = inlined_call_operand.hbm [shape: f32[2,4,16,16], index: 0, kind: input, shape index: {}]   ;;  %s738_s1 = inlined_call_operand.hbm [shape: f32[2,3,16,16], index: 1, kind: output, shape index: {}]  }
   0x1   :  { %8 = vsyncpa [#allocation3 + $0x1], 0 }
   0x2   :  { %9 = vsyncpa [#allocation4], 0 }
   0x3   :  { %11 = vsyncpa [#allocation4 + $0x1], 0  ;;  %s589_s6 = smov 0   ;;  %s591_s7 = smov 0  }
   0x4   :  { %s593_s8 = smov 0   ;;  %s595_s9 = smov 0  }
   0x5   :  { %s597_s10 = smov 0   ;;  %s599_s11 = smov 0  }
   0x6   :  { %s601_s12 = smov 0   ;;  %s603_s13 = smov 0  }
   0x7 LB: > { %s338_s14 = sadd.s32 4294967295, %s571_s13   ;;  %s339_s15 = sadd.s32 4294967294, %s571_s13   ;;  %s571_s13 = sphi %s603_s13, %s17_s13   ;;  %s567_s12 = sphi %s601_s12, %s752_s12   ;;  %s563_s11 = sphi %s599_s11, %s751_s11   ;;  %s559_s10 = sphi %s597_s10, %s750_s10   ;;  %s555_s9 = sphi %s595_s9, %s749_s9   ;;  %s551_s8 = sphi %s593_s8, %s748_s8   ;;  %s547_s7 = sphi %s591_s7, %s747_s7   ;;  %s543_s6 = sphi %s589_s6, %s746_s6  }
   0x8   : > { %s26_s16 = sadd.s32 1, %s563_s11  ;;  %s29_s17 = sadd.s32 1, %s567_s12 }
   0x9   : > { %p27_p0 = scmp.ge.s32.totalorder %s26_s16, 3  ;;  %s38_s18 = sadd.s32 1, %s551_s8 }
   0xa   : > { %p45_p1 = scmp.ne.s32.totalorder %s551_s8, %s547_s7  ;;  %p46_p2 = scmp.eq.s32.totalorder %s571_s13, 0 }
   0xb   : > { %s754_s16 = smov (%p27_p0, %s26_s16), 0  ;;  %s756_s17 = smov (!%p27_p0, %s29_s17), %s567_s12 }
   0xc   : > { %s34_s19 = ssub.s32 %s563_s11, %s754_s16  ;;  %p642_p3 = por %p46_p2, %p45_p1 }
   0xd   : > { %p31_p4 = scmp.ge.s32.totalorder %s756_s17, 2  ;;  %p51_p5 = scmp.ne.s32.totalorder %s547_s7, %s543_s6 }
   0xe   : > { %p52_p6 = scmp.eq.s32.totalorder %s338_s14, 0  ;;  %p77_p7 = scmp.eq.s32.totalorder %s338_s14, 5 }
   0xf   : > { %s758_s17 = smov (%p31_p4, %s756_s17), 0  ;;  %p83_p10 = scmp.eq.s32.totalorder %s339_s15, 5 }
  0x10   : > { %741 = sst [smem:[#allocation8_spill]] %s758_s17  ;;  %p650_p8 = por %p52_p6, %p51_p5 }
  0x11   : > { %p654_p9 = por %p77_p7, %p45_p1  ;;  %s33_s23 = ssub.s32 %s567_s12, %s758_s17 }
  0x12   : > { %s35_s24 = sor.u32 %s34_s19, %s33_s23  ;;  %p660_p12 = por %p83_p10, %p51_p5 }
  0x13   : > { %p36_p11 = scmp.eq.s32.totalorder %s35_s24, 0  ;;  %p367_p13 = scmp.lt.s32.totalorder %s571_s13, 6 }
  0x14   : > { %s103_s26 = sand.u32 1, %s551_s8   ;;  %s343_s29 = sshll.u32 %s563_s11, 1 }
  0x15   : > { %s667_s27 = scalar_select %p36_p11, %s551_s8, %s38_s18  }
  0x16   : > { %s342_s28 = sshll.u32 %s103_s26, 4  ;;  %s344_s30 = sshll.u32 %s567_s12, 3 }
  0x17   : > { %s107_s2 = scalar_lea.vmem [#allocation2], %s342_s28  ;;  %s112_s4 = sadd.s32 %s344_s30, %s343_s29 }
  0x18   : > { %s117_s3 = sshll.u32 %s107_s2, 4  ;;  %s345_s5 = sshll.u32 %s112_s4, 3  ;;  %s118_s3 = int_to_ptr.vmem [resolvable:$true] %s117_s3 }
  0x19   : > { %p360_p0 = pnand %p367_p13, %p642_p3  ;;  %s114_s19 = scalar_lea.hbm %s737_s0, %s345_s5 }
  0x1a   : > { %s115_s23 = sshll.u32 %s114_s19, 4  ;;  %s104_s18 = scalar_lea.sflag [#allocation3], %s103_s26  ;;  %s116_s23 = int_to_ptr.hbm [resolvable:$true] %s115_s23 }
  0x1b   : > { %s573_s24 = smov 128   ;;  %s574_s17 = smov 8  }
  0x1c   : > { %362 = dma.hbm_to_vmem [thread:$0]  (!%p360_p0), %s116_s23, 256, %s118_s3, %s104_s18, %s573_s24, %s573_s24, %s574_s17  }
  0x1d   : > { %p346_p1 = scmp.ge.s32.totalorder %s571_s13, 1  ;;  %p125_p2 = scmp.lt.s32.totalorder %s571_s13, 7 }
  0x1f   : > { %p126_p4 = pnand %p346_p1, %p125_p2 }
  0x20   : > { %s679_s28 = sand.u32 (!%p126_p4), 1, %s547_s7  }
  0x21   : > { %129 = sbr.rel (%p126_p4) target bundleno = 197 (0xc5), region = 24  ;;  %s347_s20 = sshll.u32 (!%p126_p4), %s679_s28, 4 }
  0x22   : > { %s132_s29 = scalar_lea.sflag (!%p126_p4), [#allocation3], %s679_s28  ;;  %s135_s30 = scalar_lea.vmem (!%p126_p4), [#allocation2], %s347_s20 }
  0x26   : > { %534 = dma.done.wait (%p650_p8), %s132_s29, 256  }
  0x27   : > { %536 = vsyncadd (%p650_p8), %s132_s29, 4294967040  ;;  %v155_v0 = vld [vmem:[%s135_s30] sm:$0xff]  ;;  %s575_s17 = smov 1   ;;  %s576_s26 = smov 127   ;;  %v156_v1 = vld [vmem:[%s135_s30 + $0x8] sm:$0xff]  ;;  %vm159_vm0 = vcmask 1046528  }
  0x28   : > { %184 = vrot.lane.b32.xlu1 %v155_v0, %s575_s17  ;;  %175 = vrot.lane.b32.xlu0 %v155_v0, %s576_s26  ;;  %v160_v2 = vrot.slane %v155_v0, 1  ;;  %v167_v3 = vrot.slane %v155_v0, 7  ;;  %v161_v4 = vrot.slane %v156_v1, 1  ;;  %vm166_vm1 = vcmask 1040384   ;;  %s354_s21 = smul.u32 6, %s559_s10  ;;  %s350_s2 = sshll.u32 %s555_s9, 1 }
  0x29   : > { %v168_v8 = vrot.slane %v156_v1, 7  ;;  %vm190_vm2 = vcmask 7168   ;;  %vm181_vm3 = vcmask 121856   ;;  %vm227_vm5 = vcmask 130048   ;;  %s154_s14 = scalar_lea.vmem [#allocation5], %s347_s20  ;;  %s231_s23 = scalar_lea.sflag [#allocation4], %s679_s28 }
  0x2a   : > { %v162_v5 = vsel %vm159_vm0, %v160_v2, %v161_v4  ;;  %v172_v6 = vsel %vm166_vm1, 0.0, %v167_v3  ;;  %v165_v9 = vsel %vm159_vm0, %v161_v4, 0.0  ;;  %s242_s3 = sadd.s32 %s354_s21, %s350_s2  ;;  %s245_s15 = sshll.u32 %s154_s14, 4  ;;  %s246_s15 = int_to_ptr.vmem [resolvable:$true] %s245_s15 }
  0x2b   : > { %v173_v7 = vsub.f32 %v162_v5, %v172_v6  ;;  %v169_v10 = vsel %vm166_vm1, %v167_v3, %v168_v8  ;;  %s351_s4 = sshll.u32 %s242_s3, 3  ;;  %s493_s30 = scalar_lea.hbm %s738_s1, 96 }
  0x2c   : > { %v174_v11 = vsub.f32 %v165_v9, %v169_v10  ;;  %s244_s9 = scalar_lea.hbm %s738_s1, %s351_s4 }
  0x2d   : > { %v195_v17 = vmul.f32 %v173_v7, %v173_v7  ;;  %s247_s19 = sshll.u32 %s244_s9, 4  ;;  %s248_s19 = int_to_ptr.hbm [resolvable:$true] %s247_s19 }
  0x2e   : > { %v196_v26 = vmul.f32 %v174_v11, %v174_v11  ;;  %s487_s18 = sshra.s32 %s248_s19, 4  ;;  %s488_s18 = int_to_ptr.hbm [resolvable:$true] %s487_s18 }
  0x2f   : > { %s489_s24 = scalar_lea.hbm %s488_s18, 16  ;;  %p494_p7 = scmp.lt.s32.totalorder %s488_s18, %s738_s1 }
  0x30   : > { %186 = vrot.lane.b32.xlu1 %v156_v1, %s575_s17  ;;  %177 = vrot.lane.b32.xlu0 %v156_v1, %s576_s26  ;;  %p490_p3 = scmp.ne.s32.totalorder %s488_s18, %s489_s24  ;;  %p495_p8 = scmp.lt.s32.totalorder %s493_s30, %s489_s24 }
  0x32   : > { %p491_p5 = pnand %p490_p3, %p654_p9  ;;  %p496_p10 = por %p495_p8, %p494_p7 }
  0x34   : > { %p492_p6 = pneg %p491_p5 }
  0x36   : > { %p497_p11 = pnand %p496_p10, %p492_p6 }
  0x9a   : > { %v185_v12 = vpop.permute.xlu1 %184  ;;  %v176_v13 = vpop.permute.xlu0 %175 }
  0x9b   : > { %v191_v14 = vsel %vm190_vm2, 0.0, %v185_v12  ;;  %v182_v15 = vsel %vm181_vm3, %v176_v13, 0.0 }
  0x9c   : > { %v193_v16 = vsub.f32 %v182_v15, %v191_v14 }
  0x9e   : > { %v197_v18 = vmul.f32 %v193_v16, %v193_v16 }
  0xa0   : > { %v199_v19 = vadd.f32 %v197_v18, %v195_v17 }
  0xa2   : > { %v201_v20 = vadd.f32 1e-06, %v199_v19  ;;  %v187_v21 = vpop.permute.xlu1 %186  ;;  %v178_v22 = vpop.permute.xlu0 %177 }
  0xa3   : > { %v192_v23 = vsel %vm190_vm2, 0.0, %v187_v21  ;;  %v183_v24 = vsel %vm181_vm3, %v178_v22, 0.0 }
  0xa4   : > { %439 = vrsqrt.f32 %v201_v20  ;;  %v194_v25 = vsub.f32 %v183_v24, %v192_v23  ;;  %vm210_vm4 = vcmp.eq.f32.partialorder %v201_v20, inf  ;;  %v213_v40 = vand.u32 2147483648, %v201_v20 }
  0xa5   : > { %vm212_vm6 = vcmp.eq.f32.partialorder %v201_v20, 0.0 }
  0xa6   : > { %v198_v27 = vmul.f32 %v194_v25, %v194_v25 }
  0xa8   : > { %v200_v28 = vadd.f32 %v198_v27, %v196_v26 }
  0xaa   : > { %v440_v29 = vpop.eup %439  ;;  %v202_v30 = vadd.f32 1e-06, %v200_v28 }
  0xab   : > { %v204_v31 = vmul.f32 %v440_v29, %v201_v20 }
  0xac   : > { %441 = vrsqrt.f32 %v202_v30  ;;  %vm222_vm7 = vcmp.eq.f32.partialorder %v202_v30, inf  ;;  %v225_v47 = vand.u32 2147483648, %v202_v30  ;;  %vm224_vm8 = vcmp.eq.f32.partialorder %v202_v30, 0.0 }
  0xad   : > { %v205_v32 = vmul.f32 %v440_v29, %v204_v31 }
  0xaf   : > { %v206_v33 = vmul.f32 0.5, %v205_v32 }
  0xb1   : > { %v207_v34 = vsub.f32 1.5, %v206_v33 }
  0xb2   : > { %v442_v35 = vpop.eup %441 }
  0xb3   : > { %v216_v36 = vmul.f32 %v442_v35, %v202_v30  ;;  %v208_v37 = vmul.f32 %v440_v29, %v207_v34 }
  0xb5   : > { %v217_v38 = vmul.f32 %v442_v35, %v216_v36  ;;  %v209_v39 = vmul.f32 %v208_v37, %v201_v20 }
  0xb7   : > { %v211_v41 = vsel %vm210_vm4, %v201_v20, %v209_v39  ;;  %v218_v42 = vmul.f32 0.5, %v217_v38 }
  0xb8   : > { %v214_v43 = vsel %vm212_vm6, %v213_v40, %v211_v41 }
  0xb9   : > { %v219_v44 = vsub.f32 1.5, %v218_v42  ;;  %228 = vst.msk [vmem:[%s154_s14] sm:$0xff] %vm227_vm5, %v214_v43 }
  0xbb   : > { %v220_v45 = vmul.f32 %v442_v35, %v219_v44 }
  0xbd   : > { %v221_v46 = vmul.f32 %v220_v45, %v202_v30 }
  0xbf   : > { %v223_v48 = vsel %vm222_vm7, %v202_v30, %v221_v46 }
  0xc0   : > { %v226_v49 = vsel %vm224_vm8, %v225_v47, %v223_v48 }
  0xc1   : > { %229 = vst.msk [vmem:[%s154_s14 + $0x8] sm:$0xff] %vm227_vm5, %v226_v49 }
  0xc2   : > { %500 = shalt.err (!%p497_p11)
}
  0xc3   : > { %s577_s28 = smov 128   ;;  %s578_s21 = smov 8  }
  0xc4   : > { %357 = dma.vmem_to_hbm [thread:$0]  (%p654_p9), %s246_s15, 256, %s248_s19, %s231_s23, %s577_s28, %s577_s28, %s578_s21  }
  0xc5 PF: > { %p368_p13 = scmp.ge.s32.totalorder %s571_s13, 2  ;;  %s262_s2 = sand.u32 1, %s543_s6  }
  0xc6   : > { %s263_s3 = scalar_lea.sflag [#allocation4], %s262_s2 }
  0xc7   : > { %p364_p0 = pnand %p368_p13, %p660_p12 }
  0xc9   : > { %p365_p1 = pneg %p364_p0 }
  0xcb   : > { %538 = dma.done.wait (%p365_p1), %s263_s3, 256  }
  0xcc   : > { %540 = vsyncadd (%p365_p1), %s263_s3, 4294967040  ;;  %s17_s13 = sadd.s32 1, %s571_s13   ;;  %s745_s22 = sld [smem:[#allocation8_spill]] }
  0xcd   : > { %p14_p2 = scmp.ge.s32.totalorder %s17_s13, 8   ;;  %s746_s6 = smov %s547_s7 }
  0xce   : > { %s747_s7 = smov %s551_s8  ;;  %s748_s8 = smov %s667_s27 }
  0xcf   : > { %s749_s9 = smov %s563_s11  ;;  %s750_s10 = smov %s567_s12 }
  0xd0   : > { %s751_s11 = smov %s754_s16  ;;  %16 = sbr.rel (!%p14_p2) target bundleno = 7 (0x7), region = 69 }
  0xd2   : > { %s752_s12 = smov %s745_s22 }
  0xd5   :  { %269 = vsyncpa [#allocation3], 1 }
  0xd6   :  { %271 = vsyncpa [#allocation3 + $0x1], 1 }
  0xd7   :  { %272 = vsyncpa [#allocation4], 1 }
  0xd8   :  { %274 = vsyncpa [#allocation4 + $0x1], 1 }

</bundles_post_ra>
